<compile_context>
chip_gen: v5e
topology: v5e:2x2
jax: 0.10.0
libtpu: 0.0.40
codegen_flags: <defaults>
</compile_context>

<pallas_src>
import functools

import jax
import jax.numpy as jnp
from jax import lax
from jax.experimental import pallas as pl
from jax.experimental.pallas import tpu as pltpu


# ---------------- Pallas kernel ----------------
def _mha_kernel(x_ref, wqkv_ref, wp_ref, bp_ref, o_ref, *, H, hs):
    x = x_ref[0]                       # (T, E) float32, current batch element
    T, E = x.shape
    HD = H * hs

    # matches `C ** (-0.5)` with C = nEmbed (full embedding dim, per the module)
    scale = jnp.float32(E) ** -0.5

    # ---- fused QKV projection: one lane-dense bf16 MXU matmul -------------
    qkv = jnp.dot(x.astype(jnp.bfloat16), wqkv_ref[...],
                  preferred_element_type=jnp.float32)        # (T, 3*H*hs) f32

    # split into per-head (H, T, hs) stacks (cheap static lane slices + stack;
    # all heavy math below is heads-batched, so no per-head live (T,T) blowup)
    def split_heads(sel):
        return jnp.stack(
            [qkv[:, sel * HD + h * hs: sel * HD + (h + 1) * hs] for h in range(H)],
            axis=0)                                          # (H, T, hs)

    q = (split_heads(0) * scale).astype(jnp.bfloat16)        # scale on q, not scores
    k = split_heads(1).astype(jnp.bfloat16)
    v = split_heads(2).astype(jnp.bfloat16)

    # ---- heads-batched attention scores (bf16 in, f32 accumulate) ---------
    scores = jnp.einsum('hqd,hkd->hqk', q, k,
                        preferred_element_type=jnp.float32)  # (H, T, T) f32

    # causal mask, built once and shared by all heads
    row = lax.broadcasted_iota(jnp.int32, (T, T), 0)
    col = lax.broadcasted_iota(jnp.int32, (T, T), 1)
    causal = (col <= row)[None, :, :]                        # (1, T, T)
    scores = jnp.where(causal, scores, -jnp.inf)

    # ---- numerically stable softmax in f32 --------------------------------
    m = jnp.max(scores, axis=-1, keepdims=True)
    p = jnp.exp(scores - m)
    denom = jnp.sum(p, axis=-1, keepdims=True)
    attn = p * pl.reciprocal(denom, approx=True)

    # TODO(synk): attention-prob dropout / output dropout omitted (eval mode).

    # ---- PV, batched over heads -------------------------------------------
    ctx = jnp.einsum('hqk,hkd->hqd', attn.astype(jnp.bfloat16), v,
                     preferred_element_type=jnp.float32)     # (H, T, hs)

    # ---- output projection folded per head (no lane-axis concat) ----------
    out_h = jnp.einsum('hqd,hde->hqe', ctx.astype(jnp.bfloat16), wp_ref[...],
                       preferred_element_type=jnp.float32)   # (H, T, E)
    out = jnp.sum(out_h, axis=0) + bp_ref[...]               # (T, E) f32
    o_ref[0] = out.astype(o_ref.dtype)


def multi_head_attention(x, wq, wk, wv, wp, bp):
    """x: (B, T, E); wq/wk/wv: (H, E, hs); wp: (H*hs, E); bp: (1, E)."""
    B, T, E = x.shape
    H, _, hs = wq.shape
    HD = H * hs

    # Fuse per-head Q/K/V weights into one (E, 3*H*hs) matrix, columns ordered
    # [q_h0..q_h(H-1) | k_h0.. | v_h0..], head blocks of width hs. bf16 for the MXU.
    def flat(w):                                   # (H, E, hs) -> (E, H*hs)
        return jnp.transpose(w, (1, 0, 2)).reshape(E, HD)

    w_qkv = jnp.concatenate([flat(wq), flat(wk), flat(wv)], axis=1).astype(jnp.bfloat16)
    wp3 = wp.reshape(H, hs, E).astype(jnp.bfloat16)    # row h*hs+d -> wp3[h, d, :]
    bp_f32 = bp.astype(jnp.float32)

    kernel = functools.partial(_mha_kernel, H=H, hs=hs)

    return pl.pallas_call(
        kernel,
        out_shape=jax.ShapeDtypeStruct((B, T, E), jnp.float32),
        grid_spec=pltpu.PrefetchScalarGridSpec(
            num_scalar_prefetch=0,
            grid=(B,),
            in_specs=[
                pl.BlockSpec((1, T, E), lambda b: (b, 0, 0)),      # x (per-batch tile)
                pl.BlockSpec((E, 3 * HD), lambda b: (0, 0)),       # fused Wqkv (grid-invariant)
                pl.BlockSpec((H, hs, E), lambda b: (0, 0, 0)),     # Wproj, per-head layout
                pl.BlockSpec((1, E), lambda b: (0, 0)),            # bproj
            ],
            out_specs=pl.BlockSpec((1, T, E), lambda b: (b, 0, 0)),
        ),
        compiler_params=pltpu.CompilerParams(
            dimension_semantics=("parallel",)),
    )(x, w_qkv, wp3, bp_f32)


# ---------------- pure-JAX f32 reference ----------------
def reference(x, wq, wk, wv, wp, bp):
    B, T, E = x.shape
    H = wq.shape[0]
    heads = []
    tril = jnp.tril(jnp.ones((T, T), jnp.float32))
    for h in range(H):
        q = x @ wq[h]
        k = x @ wk[h]
        v = x @ wv[h]
        wei = (q @ jnp.swapaxes(k, -1, -2)) * (E ** -0.5)
        wei = jnp.where(tril == 0, -jnp.inf, wei)
        wei = jax.nn.softmax(wei, axis=-1)
        heads.append(wei @ v)
    cat = jnp.concatenate(heads, axis=-1)
    return cat @ wp + bp


if __name__ == "__main__":
    # Small shapes consistent with the module's forward:
    #   nEmbed -> E = 32, numHeads -> H = 4, headSize -> hs = 8, seq T = 8 (<= blockSize), batch B = 2
    B, T, E, H, hs = 2, 8, 32, 4, 8

    key = jax.random.PRNGKey(0)
    k_x, k_q, k_k, k_v, k_p, k_b = jax.random.split(key, 6)

    x  = jax.random.normal(k_x, (B, T, E), jnp.float32)
    wq = jax.random.normal(k_q, (H, E, hs), jnp.float32) * 0.1
    wk = jax.random.normal(k_k, (H, E, hs), jnp.float32) * 0.1
    wv = jax.random.normal(k_v, (H, E, hs), jnp.float32) * 0.1
    wp = jax.random.normal(k_p, (H * hs, E), jnp.float32) * 0.1
    bp = jax.random.normal(k_b, (1, E), jnp.float32) * 0.1

    out = multi_head_attention(x, wq, wk, wv, wp, bp)
    out = jax.block_until_ready(out)

    ref = reference(x, wq, wk, wv, wp, bp)
    assert out.shape == (B, T, E)
    # Matmul inputs are bf16 (MXU) while the reference is pure f32 -> slightly looser tolerance.
    assert jnp.allclose(out, ref, atol=3e-2, rtol=3e-2), "mismatch vs reference"

    print("KERNEL_OK")
</pallas_src>

<mosaic_0001>
module attributes {stable_mosaic.version = 11 : i64} {
  func.func @_mha_kernel(%arg0: i32, %arg1: memref<1x8x32xf32, #tpu.memory_space<vmem>>, %arg2: memref<32x96xbf16, #tpu.memory_space<vmem>>, %arg3: memref<4x8x32xbf16, #tpu.memory_space<vmem>>, %arg4: memref<1x32xf32, #tpu.memory_space<vmem>>, %arg5: memref<1x8x32xf32, #tpu.memory_space<vmem>>) attributes {dimension_semantics = [#tpu.dimension_semantics<parallel>], iteration_bounds = array<i64: 2>, scalar_prefetch = 0 : i64, scratch_operands = 0 : i64, tpu.core_type = #tpu.core_type<tc>, window_params = [{transform_indices = @transform_0, window_bounds = array<i64: 1, 8, 32>}, {pipeline_mode = #tpu.pipeline_mode<synchronous>, transform_indices = @transform_1, window_bounds = array<i64: 32, 96>}, {pipeline_mode = #tpu.pipeline_mode<synchronous>, transform_indices = @transform_2, window_bounds = array<i64: 4, 8, 32>}, {pipeline_mode = #tpu.pipeline_mode<synchronous>, transform_indices = @transform_3, window_bounds = array<i64: 1, 32>}, {transform_indices = @transform_4, window_bounds = array<i64: 1, 8, 32>}]} {
    %c0 = arith.constant 0 : index
    %c0_0 = arith.constant 0 : index
    %c0_1 = arith.constant 0 : index
    %0 = vector.load %arg1[%c0, %c0_0, %c0_1] : memref<1x8x32xf32, #tpu.memory_space<vmem>>, vector<1x8x32xf32>
    %1 = vector.shape_cast %0 : vector<1x8x32xf32> to vector<8x32xf32>
    %cst = arith.constant 3.200000e+01 : f32
    %cst_2 = arith.constant -5.000000e-01 : f32
    %2 = math.powf %cst, %cst_2 : f32
    %3 = arith.truncf %1 : vector<8x32xf32> to vector<8x32xbf16>
    %c0_3 = arith.constant 0 : index
    %c0_4 = arith.constant 0 : index
    %4 = vector.load %arg2[%c0_3, %c0_4] : memref<32x96xbf16, #tpu.memory_space<vmem>>, vector<32x96xbf16>
    %cst_5 = arith.constant dense<0.000000e+00> : vector<8x96xf32>
    %5 = tpu.matmul %3, %4, %cst_5 {dimension_numbers = #tpu.dot_dimension_numbers<[1], [0], [0], [1], [0, 0, 1, 1], [], []>} : vector<8x32xbf16>, vector<32x96xbf16>, vector<8x96xf32> -> vector<8x96xf32>
    %6 = vector.extract_strided_slice %5 {offsets = [0, 0], sizes = [8, 8], strides = [1, 1]} : vector<8x96xf32> to vector<8x8xf32>
    %7 = vector.extract_strided_slice %5 {offsets = [0, 8], sizes = [8, 8], strides = [1, 1]} : vector<8x96xf32> to vector<8x8xf32>
    %8 = vector.extract_strided_slice %5 {offsets = [0, 16], sizes = [8, 8], strides = [1, 1]} : vector<8x96xf32> to vector<8x8xf32>
    %9 = vector.extract_strided_slice %5 {offsets = [0, 24], sizes = [8, 8], strides = [1, 1]} : vector<8x96xf32> to vector<8x8xf32>
    %10 = vector.shape_cast %6 : vector<8x8xf32> to vector<1x8x8xf32>
    %11 = vector.shape_cast %7 : vector<8x8xf32> to vector<1x8x8xf32>
    %12 = vector.shape_cast %8 : vector<8x8xf32> to vector<1x8x8xf32>
    %13 = vector.shape_cast %9 : vector<8x8xf32> to vector<1x8x8xf32>
    %14 = tpu.concatenate %10, %11, %12, %13 in 0 : vector<1x8x8xf32>, vector<1x8x8xf32>, vector<1x8x8xf32>, vector<1x8x8xf32> -> vector<4x8x8xf32>
    %15 = vector.broadcast %2 : f32 to vector<4x8x8xf32>
    %16 = arith.mulf %14, %15 : vector<4x8x8xf32>
    %17 = arith.truncf %16 : vector<4x8x8xf32> to vector<4x8x8xbf16>
    %18 = vector.extract_strided_slice %5 {offsets = [0, 32], sizes = [8, 8], strides = [1, 1]} : vector<8x96xf32> to vector<8x8xf32>
    %19 = vector.extract_strided_slice %5 {offsets = [0, 40], sizes = [8, 8], strides = [1, 1]} : vector<8x96xf32> to vector<8x8xf32>
    %20 = vector.extract_strided_slice %5 {offsets = [0, 48], sizes = [8, 8], strides = [1, 1]} : vector<8x96xf32> to vector<8x8xf32>
    %21 = vector.extract_strided_slice %5 {offsets = [0, 56], sizes = [8, 8], strides = [1, 1]} : vector<8x96xf32> to vector<8x8xf32>
    %22 = vector.shape_cast %18 : vector<8x8xf32> to vector<1x8x8xf32>
    %23 = vector.shape_cast %19 : vector<8x8xf32> to vector<1x8x8xf32>
    %24 = vector.shape_cast %20 : vector<8x8xf32> to vector<1x8x8xf32>
    %25 = vector.shape_cast %21 : vector<8x8xf32> to vector<1x8x8xf32>
    %26 = tpu.concatenate %22, %23, %24, %25 in 0 : vector<1x8x8xf32>, vector<1x8x8xf32>, vector<1x8x8xf32>, vector<1x8x8xf32> -> vector<4x8x8xf32>
    %27 = arith.truncf %26 : vector<4x8x8xf32> to vector<4x8x8xbf16>
    %28 = vector.extract_strided_slice %5 {offsets = [0, 64], sizes = [8, 8], strides = [1, 1]} : vector<8x96xf32> to vector<8x8xf32>
    %29 = vector.extract_strided_slice %5 {offsets = [0, 72], sizes = [8, 8], strides = [1, 1]} : vector<8x96xf32> to vector<8x8xf32>
    %30 = vector.extract_strided_slice %5 {offsets = [0, 80], sizes = [8, 8], strides = [1, 1]} : vector<8x96xf32> to vector<8x8xf32>
    %31 = vector.extract_strided_slice %5 {offsets = [0, 88], sizes = [8, 8], strides = [1, 1]} : vector<8x96xf32> to vector<8x8xf32>
    %32 = vector.shape_cast %28 : vector<8x8xf32> to vector<1x8x8xf32>
    %33 = vector.shape_cast %29 : vector<8x8xf32> to vector<1x8x8xf32>
    %34 = vector.shape_cast %30 : vector<8x8xf32> to vector<1x8x8xf32>
    %35 = vector.shape_cast %31 : vector<8x8xf32> to vector<1x8x8xf32>
    %36 = tpu.concatenate %32, %33, %34, %35 in 0 : vector<1x8x8xf32>, vector<1x8x8xf32>, vector<1x8x8xf32>, vector<1x8x8xf32> -> vector<4x8x8xf32>
    %37 = arith.truncf %36 : vector<4x8x8xf32> to vector<4x8x8xbf16>
    "tpu.trace_start"() <{level = 10 : i32, message = "hqd,hkd->hqk"}> : () -> ()
    %cst_6 = arith.constant dense<0.000000e+00> : vector<4x8x8xf32>
    %38 = tpu.matmul %17, %27, %cst_6 {dimension_numbers = #tpu.dot_dimension_numbers<[2], [2], [1], [1], [0, 0, 0, 1, 1, 1], [0], [0]>} : vector<4x8x8xbf16>, vector<4x8x8xbf16>, vector<4x8x8xf32> -> vector<4x8x8xf32>
    "tpu.trace_stop"() : () -> ()
    %39 = tpu.iota {dimensions = array<i32: 0>} : vector<8x8xi32>
    %40 = tpu.iota {dimensions = array<i32: 1>} : vector<8x8xi32>
    %41 = arith.cmpi sle, %40, %39 : vector<8x8xi32>
    %42 = vector.shape_cast %41 : vector<8x8xi1> to vector<1x8x8xi1>
    %cst_7 = arith.constant 0xFF800000 : f32
    %43 = vector.shape_cast %42 : vector<1x8x8xi1> to vector<1x8x8xi1>
    %44 = vector.broadcast %43 : vector<1x8x8xi1> to vector<4x8x8xi1>
    %45 = vector.broadcast %cst_7 : f32 to vector<4x8x8xf32>
    %46 = arith.select %44, %38, %45 : vector<4x8x8xi1>, vector<4x8x8xf32>
    %cst_8 = arith.constant dense<0xFF800000> : vector<4x8xf32>
    %47 = vector.multi_reduction <maximumf>, %46, %cst_8 [2] : vector<4x8x8xf32> to vector<4x8xf32>
    %48 = vector.shape_cast %47 : vector<4x8xf32> to vector<4x8x1xf32>
    %49 = vector.broadcast %48 : vector<4x8x1xf32> to vector<4x8x8xf32>
    %50 = arith.subf %46, %49 : vector<4x8x8xf32>
    %51 = math.exp %50 : vector<4x8x8xf32>
    %cst_9 = arith.constant dense<0.000000e+00> : vector<4x8xf32>
    %52 = vector.multi_reduction <add>, %51, %cst_9 [2] : vector<4x8x8xf32> to vector<4x8xf32>
    %53 = vector.shape_cast %52 : vector<4x8xf32> to vector<4x8x1xf32>
    %54 = tpu.reciprocal %53 {approx = true} : vector<4x8x1xf32> -> vector<4x8x1xf32>
    %55 = vector.broadcast %54 : vector<4x8x1xf32> to vector<4x8x8xf32>
    %56 = arith.mulf %51, %55 : vector<4x8x8xf32>
    %57 = arith.truncf %56 : vector<4x8x8xf32> to vector<4x8x8xbf16>
    "tpu.trace_start"() <{level = 10 : i32, message = "hqk,hkd->hqd"}> : () -> ()
    %cst_10 = arith.constant dense<0.000000e+00> : vector<4x8x8xf32>
    %58 = tpu.matmul %57, %37, %cst_10 {dimension_numbers = #tpu.dot_dimension_numbers<[2], [1], [1], [2], [0, 0, 0, 1, 1, 2], [0], [0]>} : vector<4x8x8xbf16>, vector<4x8x8xbf16>, vector<4x8x8xf32> -> vector<4x8x8xf32>
    "tpu.trace_stop"() : () -> ()
    %59 = arith.truncf %58 : vector<4x8x8xf32> to vector<4x8x8xbf16>
    %c0_11 = arith.constant 0 : index
    %c0_12 = arith.constant 0 : index
    %c0_13 = arith.constant 0 : index
    %60 = vector.load %arg3[%c0_11, %c0_12, %c0_13] : memref<4x8x32xbf16, #tpu.memory_space<vmem>>, vector<4x8x32xbf16>
    "tpu.trace_start"() <{level = 10 : i32, message = "hqd,hde->hqe"}> : () -> ()
    %cst_14 = arith.constant dense<0.000000e+00> : vector<4x8x32xf32>
    %61 = tpu.matmul %59, %60, %cst_14 {dimension_numbers = #tpu.dot_dimension_numbers<[2], [1], [1], [2], [0, 0, 0, 1, 1, 2], [0], [0]>} : vector<4x8x8xbf16>, vector<4x8x32xbf16>, vector<4x8x32xf32> -> vector<4x8x32xf32>
    "tpu.trace_stop"() : () -> ()
    %cst_15 = arith.constant dense<0.000000e+00> : vector<8x32xf32>
    %62 = vector.multi_reduction <add>, %61, %cst_15 [0] : vector<4x8x32xf32> to vector<8x32xf32>
    %c0_16 = arith.constant 0 : index
    %c0_17 = arith.constant 0 : index
    %63 = vector.load %arg4[%c0_16, %c0_17] : memref<1x32xf32, #tpu.memory_space<vmem>>, vector<1x32xf32>
    %64 = vector.broadcast %63 : vector<1x32xf32> to vector<8x32xf32>
    %65 = arith.addf %62, %64 : vector<8x32xf32>
    %c0_18 = arith.constant 0 : index
    %c0_19 = arith.constant 0 : index
    %c0_20 = arith.constant 0 : index
    %66 = vector.load %arg5[%c0_18, %c0_19, %c0_20] : memref<1x8x32xf32, #tpu.memory_space<vmem>>, vector<1x8x32xf32>
    %67 = vector.shape_cast %66 : vector<1x8x32xf32> to vector<8x32xf32>
    %68 = vector.shape_cast %65 : vector<8x32xf32> to vector<1x8x32xf32>
    tpu.vector_store %arg5[%c0_18, %c0_19, %c0_20], %68 {strides = array<i32>} : memref<1x8x32xf32, #tpu.memory_space<vmem>>, vector<1x8x32xf32>,
    return
  }
  func.func @transform_0(%arg0: i32) -> (i32, i32, i32) {
    %c0_i32 = arith.constant 0 : i32
    %c0_i32_0 = arith.constant 0 : i32
    %c0_i32_1 = arith.constant 0 : i32
    return %arg0, %c0_i32, %c0_i32_0 : i32, i32, i32
  }
  func.func @transform_1(%arg0: i32) -> (i32, i32) {
    %c0_i32 = arith.constant 0 : i32
    %c0_i32_0 = arith.constant 0 : i32
    %c0_i32_1 = arith.constant 0 : i32
    return %c0_i32, %c0_i32_0 : i32, i32
  }
  func.func @transform_2(%arg0: i32) -> (i32, i32, i32) {
    %c0_i32 = arith.constant 0 : i32
    %c0_i32_0 = arith.constant 0 : i32
    %c0_i32_1 = arith.constant 0 : i32
    %c0_i32_2 = arith.constant 0 : i32
    return %c0_i32, %c0_i32_0, %c0_i32_1 : i32, i32, i32
  }
  func.func @transform_3(%arg0: i32) -> (i32, i32) {
    %c0_i32 = arith.constant 0 : i32
    %c0_i32_0 = arith.constant 0 : i32
    %c0_i32_1 = arith.constant 0 : i32
    return %c0_i32, %c0_i32_0 : i32, i32
  }
  func.func @transform_4(%arg0: i32) -> (i32, i32, i32) {
    %c0_i32 = arith.constant 0 : i32
    %c0_i32_0 = arith.constant 0 : i32
    %c0_i32_1 = arith.constant 0 : i32
    return %arg0, %c0_i32, %c0_i32_0 : i32, i32, i32
  }
}

</mosaic_0001>

<bundles_post_ra>
// kernel: tpu_custom_call.1
= control target key start
LH: loop header
LB: loop body
LE: loop exit
PB: predicated region body
PF: predicated region fallthrough
CT: control target
= control target key end

     0   :  { %9 = vsyncpa [#allocation3], 0  ;;  %s1281_s0 = inlined_call_operand.hbm [shape: f32[2,8,32], index: 0, kind: input, shape index: {}]   ;;  %s1282_s1 = inlined_call_operand.hbm [shape: bf16[32,96], index: 1, kind: input, shape index: {}]   ;;  %s1283_s2 = inlined_call_operand.hbm [shape: bf16[4,8,32], index: 2, kind: input, shape index: {}]   ;;  %s1284_s3 = inlined_call_operand.vmem [shape: f32[1,32], index: 3, kind: input, shape index: {}]   ;;  %s1285_s4 = inlined_call_operand.hbm [shape: f32[2,8,32], index: 4, kind: output, shape index: {}]  }
   0x1   :  { %11 = vsyncpa [#allocation3 + $0x1], 0 }
   0x2   :  { %12 = vsyncpa [#allocation6], 0 }
   0x3   :  { %13 = vsyncpa [#allocation4], 0 }
   0x4   :  { %15 = vsyncpa [#allocation4 + $0x1], 0  ;;  %s1075_s15 = smov 0   ;;  %s1077_s16 = smov 0  }
   0x5   :  { %s1079_s17 = smov 0   ;;  %s1081_s18 = smov 0  }
   0x6 LB: > { %s152_s21 = sshll.u32 %s1282_s1, 4  ;;  %s1099_s22 = sadd.s32 4294967295, %s1039_s18   ;;  %s1039_s18 = sphi %s1081_s18, %s1296_s18   ;;  %s1035_s17 = sphi %s1079_s17, %s1295_s17   ;;  %s1031_s16 = sphi %s1077_s16, %s1294_s16   ;;  %s1027_s15 = sphi %s1075_s15, %s1293_s15   ;;  %s153_s21 = int_to_ptr.hbm [resolvable:$true] %s152_s21 }
   0x7   : > { %p750_p0 = scmp.ge.s32.totalorder %s1039_s18, 1  ;;  %p42_p1 = scmp.eq.s32.totalorder %s1099_s22, 0 }
   0x8   : > { %p141_p2 = scmp.lt.s32.totalorder %s1039_s18, 3  ;;  %s1041_s24 = smov [#allocation5]  }
   0x9   : > { %s154_s25 = sshll.u32 %s1041_s24, 4  ;;  %s166_s28 = sshll.u32 %s1283_s2, 4  ;;  %s155_s25 = int_to_ptr.vmem [resolvable:$true] %s154_s25  ;;  %s167_s28 = int_to_ptr.hbm [resolvable:$true] %s166_s28 }
   0xa   : > { %p1104_p3 = pnand %p750_p0, %p141_p2  ;;  %s1042_s29 = smov [#allocation7]  }
   0xb   : > { %s168_s30 = sshll.u32 %s1042_s29, 4  ;;  %s1043_s5 = smov 64   ;;  %s169_s30 = int_to_ptr.vmem [resolvable:$true] %s168_s30 }
   0xc   : > { %p800_p4 = pneg %p1104_p3  ;;  %s1044_s6 = smov 4  }
   0xd   : > { %s749_s7 = sadd.s32 4294967294, %s1039_s18   ;;  %s1118_s8 = sadd.s32 1, %s1039_s18  }
   0xe   : > { %p801_p6 = pnand %p800_p4, %p42_p1  ;;  %s25_s9 = ssub.s32 %s1039_s18, %s1118_s8 }
   0xf   : > { %s28_s10 = sadd.s32 1, %s1035_s17  ;;  %p26_p7 = scmp.eq.s32.totalorder %s25_s9, 0 }
  0x10   : > { %803 = dma.hbm_to_vmem [thread:$0]  (!%p801_p6), %s153_s21, 256, %s155_s25, [#allocation6], %s1043_s5, %s1043_s5, %s1044_s6  }
  0x11   : > { %806 = dma.hbm_to_vmem [thread:$0]  (!%p801_p6), %s167_s28, 256, %s169_s30, [#allocation6], %s1043_s5, %s1043_s5, %s1044_s6  }
  0x12   : > { %p35_p8 = scmp.ne.s32.totalorder %s1035_s17, %s1031_s16  ;;  %p36_p9 = scmp.eq.s32.totalorder %s1039_s18, 0 }
  0x13   : > { %p41_p10 = scmp.ne.s32.totalorder %s1031_s16, %s1027_s15  ;;  %p128_p13 = scmp.eq.s32.totalorder %s1099_s22, 1 }
  0x14   : > { %s1129_s11 = scalar_select %p26_p7, %s1035_s17, %s28_s10  }
  0x15   : > { %p1131_p11 = por %p36_p9, %p35_p8  ;;  %p1137_p12 = por %p42_p1, %p41_p10 }
  0x16   : > { %p134_p0 = scmp.eq.s32.totalorder %s749_s7, 1  ;;  %p817_p2 = scmp.lt.s32.totalorder %s1039_s18, 2 }
  0x17   : > { %s185_s14 = sand.u32 1, %s1035_s17   ;;  %p1144_p4 = por %p128_p13, %p35_p8 }
  0x18   : > { %p1148_p6 = por %p134_p0, %p41_p10  ;;  %s754_s21 = sshll.u32 %s185_s14, 3 }
  0x19   : > { %s755_s24 = sshll.u32 %s1039_s18, 3  ;;  %s189_s28 = scalar_lea.vmem [#allocation2], %s754_s21 }
  0x1a   : > { %s193_s27 = scalar_lea.hbm %s1281_s0, %s755_s24  ;;  %s197_s29 = sshll.u32 %s189_s28, 4  ;;  %s198_s29 = int_to_ptr.vmem [resolvable:$true] %s197_s29 }
  0x1b   : > { %s195_s30 = sshll.u32 %s193_s27, 4  ;;  %p1158_p7 = pnand %p817_p2, %p1131_p11  ;;  %s196_s30 = int_to_ptr.hbm [resolvable:$true] %s195_s30 }
  0x1c   : > { %s186_s6 = scalar_lea.sflag [#allocation3], %s185_s14  ;;  %s939_s7 = sshra.s32 %s196_s30, 4  ;;  %s940_s7 = int_to_ptr.hbm [resolvable:$true] %s939_s7 }
  0x1d   : > { %s941_s9 = scalar_lea.hbm %s940_s7, 8  ;;  %p943_p9 = pneg %p1158_p7 }
  0x1e   : > { %p942_p8 = scmp.ne.s32.totalorder %s940_s7, %s941_s9  ;;  %s946_s24 = scalar_lea.hbm %s1281_s0, 16 }
  0x1f   : > { %p947_p11 = scmp.lt.s32.totalorder %s940_s7, %s1281_s0  ;;  %p948_p0 = scmp.lt.s32.totalorder %s946_s24, %s941_s9 }
  0x20   : > { %p944_p10 = pnand %p943_p9, %p942_p8 }
  0x21   : > { %p949_p2 = por %p948_p0, %p947_p11 }
  0x22   : > { %p945_p13 = pneg %p944_p10 }
  0x24   : > { %p950_p5 = pnand %p949_p2, %p945_p13 }
  0x26   : > { %953 = shalt.err (!%p950_p5)
}
  0x27   : > { %810 = dma.hbm_to_vmem [thread:$0]  (!%p1158_p7), %s196_s30, 128, %s198_s29, %s186_s6  }
  0x28   : > { %206 = sbr.rel (%p1104_p3) target bundleno = 1108 (0x454), region = 36  ;;  %s1175_s14 = sand.u32 (!%p1104_p3), 1, %s1031_s16  }
  0x29   : > { %s757_s26 = sshll.u32 (!%p1104_p3), %s1175_s14, 3  ;;  %s209_s27 = scalar_lea.sflag (!%p1104_p3), [#allocation3], %s1175_s14 }
  0x2a   : > { %s212_s28 = scalar_lea.vmem (!%p1104_p3), [#allocation2], %s757_s26 }
  0x2d   : > { %1014 = dma.done.wait (%p1137_p12), %s209_s27, 128  }
  0x2e   : > { %1016 = vsyncadd (%p1137_p12), %s209_s27, 4294967168 }
  0x2f   : > { %1018 = dma.done.wait (%p42_p1), [#allocation6], 512  }
  0x30   : > { %1020 = vsyncadd (%p42_p1), [#allocation6], 4294966784  ;;  %v787_v0 = vld [vmem:[#allocation5 + $0x8] sm:$0xff]  ;;  %v786_v1 = vld [vmem:[#allocation5] sm:$0xff]  ;;  %vm267_vm0 = vcmask 261120   ;;  %s1045_s23 = smov 104   ;;  %v403_v37 = vlaneseq }
  0x31   : > { %277 = vmatpush.bf16.msra.mxu0 %v787_v0  ;;  %v249_v2 = vld [vmem:[%s212_s28] sm:$0xff]  ;;  %s1046_s13 = smov 120   ;;  %s1047_s29 = smov 112   ;;  %vm311_vm1 = vcmask 64512   ;;  %vm467_vm3 = vcmask 1043456  }
  0x32   : > { %v250_v3 = vpack.c.bf16 %v249_v2, %v249_v2  ;;  %s1048_s30 = smov 96   ;;  %v404_v38 = vshrl.u32 %v403_v37, 7  ;;  %v406_v39 = vand.u32 127, %v403_v37  ;;  %s1049_s5 = smov 64  }
  0x33   : > { %s783_s6 = sshll.u32 %s1099_s22, 3  ;;  %s247_s22 = scalar_lea.vmem [#allocation8], %s757_s26 }
  0x34   : > { %vm407_vm2 = vcmp.le.s32.totalorder %v406_v39, %v404_v38  ;;  %v554_v38 = vld [vmem:[#allocation7 + $0xc] sm:$0xf]  ;;  %s655_s10 = scalar_lea.hbm %s1285_s4, %s783_s6  ;;  %s657_s25 = sshll.u32 %s247_s22, 4  ;;  %s658_s25 = int_to_ptr.vmem [resolvable:$true] %s657_s25 }
  0x35   : > { %278 = vmatpush.bf16.msra.mxu0 %v786_v1  ;;  %v616_v39 = vsel %vm467_vm3, %v554_v38, 0  ;;  %s659_s12 = sshll.u32 %s655_s10, 4  ;;  %s645_s27 = scalar_lea.sflag [#allocation4], %s1175_s14  ;;  %s660_s12 = int_to_ptr.hbm [resolvable:$true] %s659_s12 }
  0x36   : > { %s983_s28 = sshra.s32 %s660_s12, 4  ;;  %s989_s26 = scalar_lea.hbm %s1285_s4, 16  ;;  %s984_s28 = int_to_ptr.hbm [resolvable:$true] %s983_s28 }
  0x37   : > { %p990_p12 = scmp.lt.s32.totalorder %s984_s28, %s1285_s4 }
  0x38   : > { %769 = vmatmul.msk.bf16.vlgmr.msra.gmra.mxu0 %vm267_vm0, %v250_v3 }
  0xb5   : > { %v280_v4 = vpop.f32.mrf.mxu0 }
  0xb6   : > { %291 = vrot.lane.b32.xlu1 %v280_v4, %s1045_s23  ;;  %285 = vrot.lane.b32.xlu0 %v280_v4, %s1046_s13  ;;  %v302_v18 = vpack.c.bf16 %v280_v4, %v280_v4  ;;  %v294_v27 = vmul.f32 0.17677669, %v280_v4  ;;  %s985_s23 = scalar_lea.hbm %s984_s28, 8 }
  0xb7   : > { %p986_p1 = scmp.ne.s32.totalorder %s984_s28, %s985_s23  ;;  %p991_p7 = scmp.lt.s32.totalorder %s989_s26, %s985_s23 }
  0xb8   : > { %v307_v19 = vunpack.c.l.b16 %v302_v18  ;;  %v298_v28 = vpack.c.bf16 %v294_v27, %v294_v27 }
  0xb9   : > { %p987_p3 = pnand %p986_p1, %p1144_p4  ;;  %p992_p8 = por %p991_p7, %p990_p12 }
  0xba   : > { %v308_v20 = vpack.c.b16 %v307_v19, %v307_v19 }
  0xbb   : > { %p988_p5 = pneg %p987_p3 }
  0xbd   : > { %v282_v5 = vpop.f32.mrf.mxu0  ;;  %p993_p9 = pnand %p992_p8, %p988_p5 }
  0xbe   : > { %288 = vrot.lane.b32.xlu0 %v280_v4, %s1047_s29 }
 0x128   : > { %v292_v6 = vpop.permute.xlu1 %291  ;;  %v286_v7 = vpop.permute.xlu0 %285 }
 0x129   : > { %v305_v8 = vpack.c.bf16 %v292_v6, %v292_v6  ;;  %v303_v9 = vpack.c.bf16 %v286_v7, %v286_v7  ;;  %v297_v33 = vmul.f32 0.17677669, %v292_v6  ;;  %v295_v34 = vmul.f32 0.17677669, %v286_v7 }
 0x12b   : > { %v380_v10 = vunpack.c.l.b16 %v305_v8  ;;  %v332_v11 = vunpack.c.l.b16 %v303_v9  ;;  %v301_v35 = vpack.c.bf16 %v297_v33, %v297_v33  ;;  %v299_v36 = vpack.c.bf16 %v295_v34, %v295_v34 }
 0x12d   : > { %v1190_v12 = vpack.c.b16 %v380_v10, %v380_v10  ;;  %v333_v13 = vpack.c.b16 %v332_v11, %v332_v11 }
 0x12f   : > { %382 = vrot.lane.b32.xlu0 %v1190_v12, %s1048_s30  ;;  %334 = vrot.lane.b32.xlu1 %v333_v13, %s1048_s30 }
 0x130   : > { %v289_v14 = vpop.permute.xlu0 %288 }
 0x131   : > { %v304_v15 = vpack.c.bf16 %v289_v14, %v289_v14  ;;  %v296_v23 = vmul.f32 0.17677669, %v289_v14 }
 0x133   : > { %v356_v16 = vunpack.c.l.b16 %v304_v15  ;;  %v300_v24 = vpack.c.bf16 %v296_v23, %v296_v23 }
 0x135   : > { %v1193_v17 = vpack.c.b16 %v356_v16, %v356_v16 }
 0x137   : > { %358 = vrot.lane.b32.xlu2 %v1193_v17, %s1048_s30 }
 0x13f   : > { %309 = vrot.lane.b32.xlu2 %v308_v20, %s1048_s30 }
 0x191   : > { %v359_v21 = vpop.permute.xlu2 %358 }
 0x192   : > { %v364_v22 = vsel %vm311_vm1, %v359_v21, 0 }
 0x193   : > { %373 = vmatpush.bf16.xpose.msra.mxu3 %v364_v22 }
 0x199   : > { %v310_v25 = vpop.permute.xlu2 %309 }
 0x19a   : > { %772 = vmatmul.msk.bf16.vlgmr.msra.gmra.mxu3 %vm311_vm1, %v300_v24  ;;  %v316_v26 = vsel %vm311_vm1, %v310_v25, 0 }
 0x19b   : > { %325 = vmatpush.bf16.xpose.msra.mxu1 %v316_v26 }
 0x1a1   : > { %v335_v29 = vpop.permute.xlu1 %334  ;;  %v383_v30 = vpop.permute.xlu0 %382 }
 0x1a2   : > { %770 = vmatmul.msk.bf16.vlgmr.msra.gmra.mxu1 %vm311_vm1, %v298_v28  ;;  %v340_v31 = vsel %vm311_vm1, %v335_v29, 0  ;;  %v388_v32 = vsel %vm311_vm1, %v383_v30, 0 }
 0x1a3   : > { %349 = vmatpush.bf16.xpose.msra.mxu2 %v340_v31  ;;  %397 = vmatpush.bf16.xpose.msrb.mxu0 %v388_v32 }
 0x1aa   : > { %771 = vmatmul.msk.bf16.vlgmr.msra.gmra.mxu2 %vm311_vm1, %v299_v36  ;;  %773 = vmatmul.msk.bf16.vlgmr.msrb.gmra.mxu0 %vm311_vm1, %v301_v35  ;;  %v551_v36 = vld [vmem:[#allocation7] sm:$0xf] }
 0x1ab   : > { %v559_v37 = vsel %vm467_vm3, %v551_v36, 0 }
 0x21d   : > { %v375_v40 = vpop.f32.mrf.mxu3 }
 0x21e   : > { %v412_v41 = vsel %vm407_vm2, %v375_v40, -inf  ;;  %v552_v40 = vld [vmem:[#allocation7 + $0x4] sm:$0xf] }
 0x21f   : > { %v327_v42 = vpop.f32.mrf.mxu1  ;;  %v420_v43 = vsel %vm311_vm1, %v412_v41, -inf }
 0x220   : > { %v410_v44 = vsel %vm407_vm2, %v327_v42, -inf  ;;  %421 = vmax.xlane.f32.xlu2 %v420_v43 }
 0x221   : > { %v414_v45 = vsel %vm311_vm1, %v410_v44, -inf }
 0x222   : > { %415 = vmax.xlane.f32.xlu0 %v414_v45 }
 0x225   : > { %v377_v46 = vpop.f32.mrf.mxu3 }
 0x227   : > { %v329_v47 = vpop.f32.mrf.mxu1  ;;  %v399_v48 = vpop.f32.mrf.mxu0 }
 0x228   : > { %v413_v49 = vsel %vm407_vm2, %v399_v48, -inf }
 0x229   : > { %v423_v50 = vsel %vm311_vm1, %v413_v49, -inf }
 0x22a   : > { %424 = vmax.xlane.f32.xlu2 %v423_v50 }
 0x22d   : > { %v351_v51 = vpop.f32.mrf.mxu2 }
 0x22e   : > { %v411_v52 = vsel %vm407_vm2, %v351_v51, -inf }
 0x22f   : > { %v401_v53 = vpop.f32.mrf.mxu0  ;;  %v417_v54 = vsel %vm311_vm1, %v411_v52, -inf }
 0x230   : > { %418 = vmax.xlane.f32.xlu1 %v417_v54 }
 0x235   : > { %v353_v55 = vpop.f32.mrf.mxu2 }
 0x236   : > { %484 = vrot.lane.b32.xlu0 %v333_v13, %s1049_s5 }
 0x23e   : > { %462 = vrot.lane.b32.xlu0 %v308_v20, %s1049_s5 }
 0x293   : > { %v422_v56 = vpop.xlane.xlu2 %421 }
 0x294   : > { %v428_v62 = vsub.f32 %v412_v41, %v422_v56  ;;  %v578_v41 = vsel %vm467_vm3, %v552_v40, 0 }
 0x295   : > { %v416_v57 = vpop.xlane.xlu0 %415 }
 0x296   : > { %v426_v58 = vsub.f32 %v410_v44, %v416_v57  ;;  %v434_v2 = vmul.f32 1.442695, %v428_v62  ;;  %v553_v44 = vld [vmem:[#allocation7 + $0x8] sm:$0xf] }
 0x297   : > { %v597_v45 = vsel %vm467_vm3, %v553_v44, 0 }
 0x298   : > { %v430_v59 = vmul.f32 1.442695, %v426_v58 }
 0x29a   : > { %863 = vpow2.f32 %v430_v59 }
 0x29d   : > { %v425_v60 = vpop.xlane.xlu2 %424 }
 0x29e   : > { %v429_v61 = vsub.f32 %v413_v49, %v425_v60 }
 0x2a0   : > { %v864_v63 = vpop.eup %863  ;;  %v436_v0 = vmul.f32 1.442695, %v429_v61 }
 0x2a1   : > { %v438_v1 = vsel %vm311_vm1, %v864_v63, 0.0 }
 0x2a2   : > { %865 = vpow2.f32 %v436_v0  ;;  %439 = vadd.xlane.f32.xlu2 %v438_v1 }
 0x2a3   : > { %v419_v3 = vpop.xlane.xlu1 %418  ;;  %867 = vpow2.f32 %v434_v2 }
 0x2a4   : > { %v427_v4 = vsub.f32 %v411_v52, %v419_v3 }
 0x2a6   : > { %v432_v5 = vmul.f32 1.442695, %v427_v4  ;;  %v862_v4 = vld [vmem:[%s1284_s3] ss:$0 sm:$0xff] }
 0x2a8   : > { %v866_v6 = vpop.eup %865  ;;  %869 = vpow2.f32 %v432_v5  ;;  %v485_v7 = vpop.permute.xlu0 %484 }
 0x2a9   : > { %v490_v8 = vsel %vm467_vm3, %v485_v7, 0  ;;  %v447_v9 = vsel %vm311_vm1, %v866_v6, 0.0  ;;  %v868_v10 = vpop.eup %867 }
 0x2aa   : > { %499 = vmatpush.bf16.msrb.mxu2 %v490_v8  ;;  %448 = vadd.xlane.f32.xlu2 %v447_v9  ;;  %v444_v16 = vsel %vm311_vm1, %v868_v10, 0.0 }
 0x2ae   : > { %v870_v11 = vpop.eup %869  ;;  %587 = vmatpush.bf16.msra.mxu2 %v578_v41 }
 0x2af   : > { %v441_v13 = vsel %vm311_vm1, %v870_v11, 0.0 }
 0x2b0   : > { %442 = vadd.xlane.f32.xlu1 %v441_v13  ;;  %v463_v14 = vpop.permute.xlu0 %462 }
 0x2b1   : > { %v469_v15 = vsel %vm467_vm3, %v463_v14, 0 }
 0x2b2   : > { %478 = vmatpush.bf16.msrb.mxu1 %v469_v15  ;;  %445 = vadd.xlane.f32.xlu2 %v444_v16 }
 0x2b6   : > { %568 = vmatpush.bf16.msra.mxu1 %v559_v37 }
 0x2c9   : > { %505 = vrot.lane.b32.xlu1 %v1193_v17, %s1049_s5 }
 0x2ca   : > { %526 = vrot.lane.b32.xlu2 %v1190_v12, %s1049_s5 }
 0x315   : > { %v440_v18 = vpop.xlane.xlu2 %439 }
 0x316   : > { %871 = vrcp.f32 %v440_v18 }
 0x31c   : > { %v872_v19 = vpop.eup %871 }
 0x31d   : > { %v454_v20 = vmul.f32 %v872_v19, %v864_v63  ;;  %v449_v21 = vpop.xlane.xlu2 %448 }
 0x31e   : > { %873 = vrcp.f32 %v449_v21 }
 0x31f   : > { %v458_v22 = vpack.c.bf16 %v454_v20, %v454_v20 }
 0x321   : > { %774 = vmatmul.msk.bf16.vlgmr.msrb.gmra.mxu1 %vm311_vm1, %v458_v22 }
 0x323   : > { %v443_v23 = vpop.xlane.xlu1 %442 }
 0x324   : > { %875 = vrcp.f32 %v443_v23  ;;  %v874_v25 = vpop.eup %873 }
 0x325   : > { %v446_v24 = vpop.xlane.xlu2 %445  ;;  %v457_v28 = vmul.f32 %v874_v25, %v866_v6 }
 0x326   : > { %877 = vrcp.f32 %v446_v24 }
 0x327   : > { %v461_v30 = vpack.c.bf16 %v457_v28, %v457_v28 }
 0x32a   : > { %v876_v26 = vpop.eup %875 }
 0x32b   : > { %v455_v27 = vmul.f32 %v876_v26, %v870_v11 }
 0x32c   : > { %v878_v31 = vpop.eup %877 }
 0x32d   : > { %v527_v17 = vpop.permute.xlu2 %526  ;;  %v459_v29 = vpack.c.bf16 %v455_v27, %v455_v27  ;;  %v456_v32 = vmul.f32 %v878_v31, %v868_v10 }
 0x32e   : > { %v532_v12 = vsel %vm467_vm3, %v527_v17, 0 }
 0x32f   : > { %775 = vmatmul.msk.bf16.vlgmr.msrb.gmra.mxu2 %vm311_vm1, %v459_v29  ;;  %541 = vmatpush.bf16.msra.mxu0 %v532_v12  ;;  %v460_v35 = vpack.c.bf16 %v456_v32, %v456_v32 }
 0x332   : > { %777 = vmatmul.msk.bf16.vlgmr.msra.gmra.mxu0 %vm311_vm1, %v461_v30 }
 0x333   : > { %625 = vmatpush.bf16.msrb.mxu0 %v616_v39 }
 0x33b   : > { %v506_v33 = vpop.permute.xlu1 %505 }
 0x33c   : > { %v511_v34 = vsel %vm467_vm3, %v506_v33, 0 }
 0x33d   : > { %520 = vmatpush.bf16.msrb.mxu3 %v511_v34 }
 0x340   : > { %776 = vmatmul.msk.bf16.vlgmr.msrb.gmra.mxu3 %vm311_vm1, %v460_v35 }
 0x341   : > { %606 = vmatpush.bf16.msra.mxu3 %v597_v45 }
 0x39e   : > { %v480_v42 = vpop.f32.mrf.mxu1 }
 0x39f   : > { %v547_v43 = vpack.c.bf16 %v480_v42, %v480_v42 }
 0x3a1   : > { %778 = vmatmul.msk.bf16.vlgmr.msra.gmra.mxu1 %vm311_vm1, %v547_v43 }
 0x3a6   : > { %v482_v46 = vpop.f32.mrf.mxu1 }
 0x3af   : > { %v543_v47 = vpop.f32.mrf.mxu0 }
 0x3b0   : > { %v550_v48 = vpack.c.bf16 %v543_v47, %v543_v47 }
 0x3b2   : > { %v501_v49 = vpop.f32.mrf.mxu2  ;;  %781 = vmatmul.msk.bf16.vlgmr.msrb.gmra.mxu0 %vm311_vm1, %v550_v48 }
 0x3b3   : > { %v548_v50 = vpack.c.bf16 %v501_v49, %v501_v49 }
 0x3b5   : > { %779 = vmatmul.msk.bf16.vlgmr.msra.gmra.mxu2 %vm311_vm1, %v548_v50 }
 0x3b7   : > { %v545_v51 = vpop.f32.mrf.mxu0 }
 0x3ba   : > { %v503_v52 = vpop.f32.mrf.mxu2 }
 0x3c3   : > { %v522_v53 = vpop.f32.mrf.mxu3 }
 0x3c4   : > { %v549_v54 = vpack.c.bf16 %v522_v53, %v522_v53 }
 0x3c6   : > { %780 = vmatmul.msk.bf16.vlgmr.msra.gmra.mxu3 %vm311_vm1, %v549_v54 }
 0x3cb   : > { %v524_v55 = vpop.f32.mrf.mxu3 }
 0x41e   : > { %v570_v56 = vpop.f32.mrf.mxu1 }
 0x41f   : > { %v631_v63 = vsel %vm267_vm0, %v570_v56, 0.0 }
 0x426   : > { %v572_v57 = vpop.f32.mrf.mxu1 }
 0x42f   : > { %v627_v58 = vpop.f32.mrf.mxu0 }
 0x430   : > { %v636_v5 = vsel %vm267_vm0, %v627_v58, 0.0 }
 0x437   : > { %v629_v59 = vpop.f32.mrf.mxu0 }
 0x438   : > { %v589_v60 = vpop.f32.mrf.mxu2 }
 0x439   : > { %v632_v62 = vsel %vm267_vm0, %v589_v60, 0.0 }
 0x43a   : > { %v633_v0 = vadd.f32 %v632_v62, %v631_v63 }
 0x440   : > { %v591_v61 = vpop.f32.mrf.mxu2 }
 0x449   : > { %v608_v1 = vpop.f32.mrf.mxu3 }
 0x44a   : > { %v634_v2 = vsel %vm267_vm0, %v608_v1, 0.0 }
 0x44b   : > { %v635_v3 = vadd.f32 %v634_v2, %v633_v0 }
 0x44d   : > { %v637_v6 = vadd.f32 %v636_v5, %v635_v3 }
 0x44f   : > { %v642_v7 = vadd.f32 %v862_v4, %v637_v6 }
 0x451   : > { %v610_v8 = vpop.f32.mrf.mxu3  ;;  %643 = vst.msk [vmem:[%s247_s22] sm:$0xff] %vm267_vm0, %v642_v7 }
 0x452   : > { %996 = shalt.err (!%p993_p9)
}
 0x453   : > { %798 = dma.vmem_to_hbm [thread:$0]  (%p1144_p4), %s658_s25, 128, %s660_s12, %s645_s27  }
 0x454 PF: > { %s671_s14 = sand.u32 1, %s1027_s15   ;;  %p1292_p10 = scmp.ge.s32.totalorder %s1039_s18, 2 }
 0x455   : > { %s672_s6 = scalar_lea.sflag [#allocation4], %s671_s14 }
 0x456   : > { %p812_p13 = pnand %p1292_p10, %p1148_p6 }
 0x458   : > { %p813_p11 = pneg %p812_p13 }
 0x45a   : > { %1022 = dma.done.wait (%p813_p11), %s672_s6, 128  }
 0x45b   : > { %1024 = vsyncadd (%p813_p11), %s672_s6, 4294967168  ;;  %p18_p0 = scmp.ge.s32.totalorder %s1118_s8, 4   ;;  %s1293_s15 = smov %s1031_s16 }
 0x45c   : > { %s1294_s16 = smov %s1035_s17  ;;  %s1295_s17 = smov %s1129_s11 }
 0x45d   : > { %s1296_s18 = smov %s1118_s8  ;;  %20 = sbr.rel (!%p18_p0) target bundleno = 6 (0x6), region = 89 }
 0x462   :  { %678 = vsyncpa [#allocation3], 1 }
 0x463   :  { %680 = vsyncpa [#allocation3 + $0x1], 1 }
 0x464   :  { %681 = vsyncpa [#allocation6], 1 }
 0x465   :  { %682 = vsyncpa [#allocation4], 1 }
 0x466   :  { %684 = vsyncpa [#allocation4 + $0x1], 1 }

</bundles_post_ra>
